<compile_context>
chip_gen: v7x
topology: tpu7x:2x2x1
jax: 0.10.0
libtpu: 0.0.40
codegen_flags: <defaults>
</compile_context>

<pallas_src>
import functools

import jax
import jax.numpy as jnp
from jax import lax
from jax.experimental import pallas as pl
from jax.experimental.pallas import tpu as pltpu

LN_EPS = 1e-5            # torch.nn.LayerNorm default
MASK_NEG = 1e10          # matches the PyTorch module's (1 - keep) * 1e10
MIB = 1024 * 1024


def _recip(x):
    # EUP-seeded approximate reciprocal (free EUP slot) + one Newton-Raphson
    # step: keeps ~f32 accuracy while avoiding a full VPU divide sequence.
    r = pl.reciprocal(x, approx=True)
    return r * (2.0 - x * r)


def _erf_f32(x):
    # Abramowitz & Stegun 7.1.26 rational approximation of erf
    # (max abs err ~1.5e-7, i.e. float32-level accuracy).
    p = 0.3275911
    a1, a2, a3, a4, a5 = (0.254829592, -0.284496736, 1.421413741,
                          -1.453152027, 1.061405429)
    s = jnp.where(x >= 0.0, 1.0, -1.0)
    ax = jnp.abs(x)
    t = _recip(1.0 + p * ax)
    poly = ((((a5 * t + a4) * t + a3) * t + a2) * t + a1) * t
    return s * (1.0 - poly * jnp.exp(-ax * ax))


def _gelu_exact(x):
    # matches torch.nn.GELU() default (erf-based, approximate='none')
    return 0.5 * x * (1.0 + _erf_f32(x * 0.7071067811865475))


def _token_agg_body(x_ref, bias, g_ref, b_ref, w1_ref, b1_ref, w2_ref, b2_ref,
                    o_ref, mxu_dtype):
    xb = x_ref[...]                                            # (Bt, N, D) io dtype
    bt, n, d = xb.shape
    k = w2_ref.shape[1]
    cast = (lambda a: a) if mxu_dtype is None else (lambda a: a.astype(mxu_dtype))

    # --- LayerNorm over the feature dim on a tall (Bt*N, D) slab, in f32 ---
    xf = xb.reshape(bt * n, d).astype(jnp.float32)
    mu = jnp.mean(xf, axis=-1, keepdims=True)
    xc = xf - mu
    var = jnp.mean(xc * xc, axis=-1, keepdims=True)
    xn = xc * lax.rsqrt(var + LN_EPS)
    xn = xn * g_ref[...] + b_ref[...]                          # (Bt*N, D)

    # --- MLP: Linear(D->H) -> GELU -> Linear(H->K); scale folded into w2/b2.
    # w1/w2 are streamed in mxu_dtype already when it is set; accumulation f32.
    h = jnp.dot(cast(xn), w1_ref[...],
                preferred_element_type=jnp.float32) + b1_ref[...]
    h = _gelu_exact(h)                                         # (Bt*N, H)
    logits = jnp.dot(cast(h), w2_ref[...],
                     preferred_element_type=jnp.float32) + b2_ref[...]
    logits = logits.reshape(bt, n, k)                          # (Bt, N, K)

    # --- additive mask bias (host-precomputed -(1-keep)*1e10), one VPU add ---
    if bias is not None:                                       # bias: (Bt, N, 1) f32
        logits = logits + bias

    # --- softmax over the token axis; NO (N,K)->(K,N) transpose ---
    m = jnp.max(logits, axis=1, keepdims=True)
    e = jnp.exp(logits - m)
    s = jnp.sum(e, axis=1, keepdims=True)                      # (Bt, 1, K) - tiny
    w = e * _recip(s)                                          # softmax over tokens

    # --- out[b,k,d] = sum_n w[b,n,k] * x[b,n,d] ---
    # Single batched contraction over the token axis + one lane-dense
    # (Bt*K, D) output store (replaces the old per-batch loop of tiny dots).
    out = jnp.einsum('bnk,bnd->bkd', cast(w), cast(xb),
                     preferred_element_type=jnp.float32)       # (Bt, K, D)
    o_ref[...] = out.astype(o_ref.dtype)


def _kernel_nomask(x_ref, g_ref, b_ref, w1_ref, b1_ref, w2_ref, b2_ref, o_ref,
                   *, mxu_dtype):
    _token_agg_body(x_ref, None, g_ref, b_ref, w1_ref, b1_ref, w2_ref, b2_ref,
                    o_ref, mxu_dtype)


def _kernel_mask(x_ref, bias_ref, g_ref, b_ref, w1_ref, b1_ref, w2_ref, b2_ref,
                 o_ref, *, mxu_dtype):
    _token_agg_body(x_ref, bias_ref[...], g_ref, b_ref, w1_ref, b1_ref, w2_ref,
                    b2_ref, o_ref, mxu_dtype)


def _chip_config():
    """Generation-aware (vmem_budget, vmem_limit_bytes, n_parallel_cores).

    v7x: 64 MiB physical VMEM *per TensorCore*, 2 TCs share the 'parallel'
    grid axis -> conservative budget, <=56 MiB scoped limit, even step count.
    v5e / v6e (128 MiB VMEM, single TC): larger budget/limit so blocks grow.
    v4 / v5p (megacore): 128 MiB VMEM, 2 cores on the 'parallel' axis.
    """
    kind = ""
    try:
        kind = jax.devices()[0].device_kind.lower()
    except Exception:
        pass
    if "v7" in kind:
        return 18 * MIB, 56 * MIB, 2
    n_cores = 2 if ("v4" in kind or "v5p" in kind) else 1
    return 40 * MIB, 96 * MIB, n_cores


def _round_up(v, m):
    return -(-v // m) * m


def _pick_block_b(B, N, D, H, K, max_block_b, io_itemsize, vmem_budget, n_cores):
    """Largest divisor of B whose per-step VMEM working set fits the budget.

    Counts the *padded* VMEM footprint: K-/H-wide slabs pad their lane dim to
    128, size-1 lane dims pad to 128, sublane dims pad to 8 (the old estimate
    undercounted these by up to ~16x at large N)."""
    f32 = 4
    lane = lambda v: _round_up(max(int(v), 1), 128)
    sub = lambda v: _round_up(max(int(v), 1), 8)

    # streamed per batch element (double-buffered by the BlockSpec pipeline)
    stream = (io_itemsize * (sub(N) * lane(D) + sub(K) * lane(D))   # x in, out
              + f32 * sub(N) * lane(1))                             # mask bias (N,1)
    # live f32 intermediates per batch element inside the kernel body
    live = f32 * (2 * N * lane(D)      # LayerNorm working copies of x
                  + N * lane(H)        # hidden activations (H padded to lanes)
                  + 3 * N * lane(K)    # logits / exp / softmax weights (K padded)
                  + sub(K) * lane(D))  # f32 result before the output cast
    # weight/bias blocks (double-buffered by default), independent of bt
    # TODO(synk): pipeline_mode=pl.Buffered(1) on the constant-index weight
    # specs would reclaim the second buffer; left at the default here.
    wfixed = 2 * f32 * (2 * sub(1) * lane(D) + sub(D) * lane(H) + sub(1) * lane(H)
                        + sub(H) * lane(K) + sub(1) * lane(K))

    avail = max(vmem_budget - wfixed, 2 * stream + live)
    bt = max(1, min(max_block_b, B, avail // (2 * stream + live)))

    if n_cores > 1:
        if B >= 2 * n_cores:
            bt = min(bt, B // n_cores)        # >= one step per TensorCore
    else:
        if B >= 3:
            bt = min(bt, max(1, B // 3))      # >=3 steps so DMA pipelines overlap

    while B % bt:                             # largest divisor of B <= bt
        bt -= 1
    if n_cores > 1:
        # prefer a step count that is a multiple of the core count (no idle TC
        # on the last step of the 'parallel' batch axis)
        while bt > 1 and (B // bt) % n_cores:
            bt -= 1
            while B % bt:
                bt -= 1
    return bt


def token_aggregation(x, params, keep_policy=None, *, block_b=32,
                      io_dtype=None, mxu_dtype=None, out_dtype=None):
    """x: (B, N, D). params = (gamma, beta, w1, b1, w2, b2, scale) as in the
    PyTorch module. keep_policy: optional (B, N) {0,1} token mask.

    io_dtype:  dtype used to stream x and the output through HBM (the kernel is
               HBM-bound at module shapes; jnp.bfloat16 halves the dominant
               traffic - callers should ideally pass x already in bf16).
               Default None keeps x.dtype.
    mxu_dtype: matmul operand dtype (jnp.bfloat16 recommended on v6e/v7x,
               ~1e-3-level relative accuracy cost vs the f32 PyTorch module).
    Returns (B, K, D) in out_dtype (defaults to io dtype)."""
    B, N, D = x.shape
    gamma, beta, w1, b1, w2, b2, scale = params
    H = w1.shape[1]
    K = w2.shape[1]

    io_dt = jnp.dtype(io_dtype) if io_dtype is not None else jnp.dtype(x.dtype)
    out_dt = jnp.dtype(out_dtype) if out_dtype is not None else io_dt
    if x.dtype != io_dt:
        x = x.astype(io_dt)

    # Fold the (1,1,1) scale parameter into the last linear layer (one-time,
    # tiny host op): (h @ w2 + b2) * s == h @ (w2*s) + (b2*s).
    s = scale.reshape(()).astype(jnp.float32)
    w2s = w2.astype(jnp.float32) * s
    b2s = b2.astype(jnp.float32) * s

    wt_dt = jnp.float32 if mxu_dtype is None else jnp.dtype(mxu_dtype)
    gamma2 = gamma.reshape(1, D).astype(jnp.float32)
    beta2 = beta.reshape(1, D).astype(jnp.float32)
    w1c = w1.astype(wt_dt)
    b1_2 = b1.reshape(1, H).astype(jnp.float32)
    w2c = w2s.astype(wt_dt)
    b2_2 = b2s.reshape(1, K).astype(jnp.float32)

    vmem_budget, vmem_limit, n_cores = _chip_config()
    bt = _pick_block_b(B, N, D, H, K, block_b, io_dt.itemsize, vmem_budget, n_cores)
    grid = (B // bt,)

    full = lambda i: (0, 0)
    x_spec = pl.BlockSpec((bt, N, D), lambda i: (i, 0, 0))
    w_specs = [
        pl.BlockSpec((1, D), full),   # LayerNorm gamma
        pl.BlockSpec((1, D), full),   # LayerNorm beta
        pl.BlockSpec((D, H), full),   # w1 (mxu dtype)
        pl.BlockSpec((1, H), full),   # b1
        pl.BlockSpec((H, K), full),   # w2 (scale folded, mxu dtype)
        pl.BlockSpec((1, K), full),   # b2 (scale folded)
    ]
    out_spec = pl.BlockSpec((bt, K, D), lambda i: (i, 0, 0))

    if keep_policy is None:
        kernel = functools.partial(_kernel_nomask, mxu_dtype=mxu_dtype)
        in_specs = [x_spec] + w_specs
        args = (x, gamma2, beta2, w1c, b1_2, w2c, b2_2)
    else:
        # Host-precomputed additive bias: one VPU add per element in-kernel
        # instead of re-doing (1 - keep) * 1e10 every grid step.
        bias = -(1.0 - keep_policy.reshape(B, N, 1).astype(jnp.float32)) * MASK_NEG
        kernel = functools.partial(_kernel_mask, mxu_dtype=mxu_dtype)
        in_specs = [x_spec, pl.BlockSpec((bt, N, 1), lambda i: (i, 0, 0))] + w_specs
        args = (x, bias, gamma2, beta2, w1c, b1_2, w2c, b2_2)

    # Advisory cost hint so XLA schedules neighbours around this mem-bound call.
    flops = 2 * B * N * (D * H + H * K + K * D) + 10 * B * N * D
    transcendentals = B * N * (H + K)
    bytes_accessed = ((B * N * D + B * K * D) * io_dt.itemsize
                      + (D * H + H * K) * jnp.dtype(wt_dt).itemsize
                      + (2 * D + H + K) * 4)
    if keep_policy is not None:
        bytes_accessed += B * N * 4
    cost = pl.CostEstimate(flops=int(flops),
                           transcendentals=int(transcendentals),
                           bytes_accessed=int(bytes_accessed))

    return pl.pallas_call(
        kernel,
        out_shape=jax.ShapeDtypeStruct((B, K, D), out_dt),
        grid_spec=pltpu.PrefetchScalarGridSpec(
            num_scalar_prefetch=0,
            grid=grid,
            in_specs=in_specs,
            out_specs=out_spec,
        ),
        compiler_params=pltpu.CompilerParams(
            dimension_semantics=("parallel",),
            vmem_limit_bytes=vmem_limit,
        ),
        cost_estimate=cost,
    )(*args)


if __name__ == "__main__":
    key = jax.random.PRNGKey(0)
    ks = jax.random.split(key, 10)

    # Pure-JAX reference mirroring the PyTorch forward, in f32.
    def ref(x, params, keep_policy=None):
        gamma, beta, w1, b1, w2, b2, scale = params
        mu = jnp.mean(x, axis=-1, keepdims=True)
        var = jnp.mean((x - mu) ** 2, axis=-1, keepdims=True)
        xn = (x - mu) / jnp.sqrt(var + LN_EPS) * gamma + beta
        h = jax.nn.gelu(xn @ w1 + b1, approximate=False)
        wgt = jnp.swapaxes(h @ w2 + b2, 1, 2) * scale
        if keep_policy is not None:
            wgt = wgt - (1.0 - keep_policy[:, None, :]) * MASK_NEG
        wgt = jax.nn.softmax(wgt, axis=2)
        return jnp.einsum('bkn,bnd->bkd', wgt, x)

    # Small shapes consistent with the module: dim=128 (multiple of 128 like the
    # default dim=512), dim_ratio=0.25 -> hidden=32, keeped_patches=8.
    D, H, K = 128, 32, 8
    gamma = 1.0 + 0.1 * jax.random.normal(ks[0], (D,), jnp.float32)
    beta = 0.01 * jax.random.normal(ks[1], (D,), jnp.float32)
    w1 = jax.random.normal(ks[2], (D, H), jnp.float32) * 0.05
    b1 = jax.random.normal(ks[3], (H,), jnp.float32) * 0.01
    w2 = jax.random.normal(ks[4], (H, K), jnp.float32) * 0.05
    b2 = jax.random.normal(ks[5], (K,), jnp.float32) * 0.01
    scale = jnp.full((1, 1, 1), 1.5, jnp.float32)          # exercise the scale fold
    params = (gamma, beta, w1, b1, w2, b2, scale)

    # ---- config 1: f32 end-to-end (tight accuracy check) ----
    B1, N1 = 4, 16
    x1 = jax.random.normal(ks[6], (B1, N1, D), dtype=jnp.float32)
    keep1 = (jax.random.uniform(ks[7], (B1, N1)) > 0.3).astype(jnp.float32)

    out_a = token_aggregation(x1, params, keep_policy=None)
    out_b = token_aggregation(x1, params, keep_policy=keep1)
    jax.block_until_ready((out_a, out_b))

    r_a = ref(x1, params, None)
    r_b = ref(x1, params, keep1)
    assert out_a.shape == (B1, K, D) and out_b.shape == (B1, K, D)
    assert bool(jnp.all(jnp.isfinite(out_a))) and bool(jnp.all(jnp.isfinite(out_b)))
    assert bool(jnp.allclose(out_a, r_a, atol=2e-3, rtol=2e-3))
    assert bool(jnp.allclose(out_b, r_b, atol=2e-3, rtol=2e-3))

    # ---- config 2: bf16 HBM streaming + bf16 MXU (the mem-bound production
    #      setting from the perf review), more tokens ----
    B2, N2 = 4, 128
    x2 = jax.random.normal(ks[8], (B2, N2, D), dtype=jnp.float32)
    keep2 = (jax.random.uniform(ks[9], (B2, N2)) > 0.3).astype(jnp.float32)

    out_c = token_aggregation(x2, params, keep_policy=None,
                              io_dtype=jnp.bfloat16, mxu_dtype=jnp.bfloat16)
    out_d = token_aggregation(x2, params, keep_policy=keep2,
                              io_dtype=jnp.bfloat16, mxu_dtype=jnp.bfloat16)
    jax.block_until_ready((out_c, out_d))

    x2_rt = x2.astype(jnp.bfloat16).astype(jnp.float32)   # same input rounding
    r_c = ref(x2_rt, params, None)
    r_d = ref(x2_rt, params, keep2)
    assert out_c.shape == (B2, K, D) and out_d.shape == (B2, K, D)
    assert out_c.dtype == jnp.bfloat16 and out_d.dtype == jnp.bfloat16
    assert bool(jnp.all(jnp.isfinite(out_c.astype(jnp.float32))))
    assert bool(jnp.all(jnp.isfinite(out_d.astype(jnp.float32))))
    assert bool(jnp.allclose(out_c.astype(jnp.float32), r_c, atol=6e-2, rtol=6e-2))
    assert bool(jnp.allclose(out_d.astype(jnp.float32), r_d, atol=6e-2, rtol=6e-2))

    print("KERNEL_OK")
</pallas_src>

<mosaic_0001>
module attributes {stable_mosaic.version = 11 : i64} {
  func.func @_kernel_nomask(%arg0: i32, %arg1: memref<1x16x128xf32, #tpu.memory_space<vmem>>, %arg2: memref<1x128xf32, #tpu.memory_space<vmem>>, %arg3: memref<1x128xf32, #tpu.memory_space<vmem>>, %arg4: memref<128x32xf32, #tpu.memory_space<vmem>>, %arg5: memref<1x32xf32, #tpu.memory_space<vmem>>, %arg6: memref<32x8xf32, #tpu.memory_space<vmem>>, %arg7: memref<1x8xf32, #tpu.memory_space<vmem>>, %arg8: memref<1x8x128xf32, #tpu.memory_space<vmem>>) attributes {dimension_semantics = [#tpu.dimension_semantics<parallel>], iteration_bounds = array<i64: 4>, scalar_prefetch = 0 : i64, scratch_operands = 0 : i64, tpu.core_type = #tpu.core_type<tc>, window_params = [{transform_indices = @transform_0, window_bounds = array<i64: 1, 16, 128>}, {pipeline_mode = #tpu.pipeline_mode<synchronous>, transform_indices = @transform_1, window_bounds = array<i64: 1, 128>}, {pipeline_mode = #tpu.pipeline_mode<synchronous>, transform_indices = @transform_2, window_bounds = array<i64: 1, 128>}, {pipeline_mode = #tpu.pipeline_mode<synchronous>, transform_indices = @transform_3, window_bounds = array<i64: 128, 32>}, {pipeline_mode = #tpu.pipeline_mode<synchronous>, transform_indices = @transform_4, window_bounds = array<i64: 1, 32>}, {pipeline_mode = #tpu.pipeline_mode<synchronous>, transform_indices = @transform_5, window_bounds = array<i64: 32, 8>}, {pipeline_mode = #tpu.pipeline_mode<synchronous>, transform_indices = @transform_6, window_bounds = array<i64: 1, 8>}, {transform_indices = @transform_7, window_bounds = array<i64: 1, 8, 128>}]} {
    %c0 = arith.constant 0 : index
    %c0_0 = arith.constant 0 : index
    %c0_1 = arith.constant 0 : index
    %0 = vector.load %arg1[%c0, %c0_0, %c0_1] : memref<1x16x128xf32, #tpu.memory_space<vmem>>, vector<1x16x128xf32>
    %1 = vector.shape_cast %0 : vector<1x16x128xf32> to vector<16x128xf32>
    %cst = arith.constant dense<0.000000e+00> : vector<16xf32>
    %2 = vector.multi_reduction <add>, %1, %cst [1] : vector<16x128xf32> to vector<16xf32>
    %3 = vector.shape_cast %2 : vector<16xf32> to vector<16x1xf32>
    %cst_2 = arith.constant 1.280000e+02 : f32
    %4 = vector.broadcast %cst_2 : f32 to vector<16x1xf32>
    %5 = arith.divf %3, %4 : vector<16x1xf32>
    %6 = vector.broadcast %5 : vector<16x1xf32> to vector<16x128xf32>
    %7 = arith.subf %1, %6 : vector<16x128xf32>
    %8 = arith.mulf %7, %7 : vector<16x128xf32>
    %cst_3 = arith.constant dense<0.000000e+00> : vector<16xf32>
    %9 = vector.multi_reduction <add>, %8, %cst_3 [1] : vector<16x128xf32> to vector<16xf32>
    %10 = vector.shape_cast %9 : vector<16xf32> to vector<16x1xf32>
    %cst_4 = arith.constant 1.280000e+02 : f32
    %11 = vector.broadcast %cst_4 : f32 to vector<16x1xf32>
    %12 = arith.divf %10, %11 : vector<16x1xf32>
    %cst_5 = arith.constant 9.99999974E-6 : f32
    %13 = vector.broadcast %cst_5 : f32 to vector<16x1xf32>
    %14 = arith.addf %12, %13 : vector<16x1xf32>
    %15 = math.rsqrt %14 : vector<16x1xf32>
    %16 = vector.broadcast %15 : vector<16x1xf32> to vector<16x128xf32>
    %17 = arith.mulf %7, %16 : vector<16x128xf32>
    %c0_6 = arith.constant 0 : index
    %c0_7 = arith.constant 0 : index
    %18 = vector.load %arg2[%c0_6, %c0_7] : memref<1x128xf32, #tpu.memory_space<vmem>>, vector<1x128xf32>
    %19 = vector.broadcast %18 : vector<1x128xf32> to vector<16x128xf32>
    %20 = arith.mulf %17, %19 : vector<16x128xf32>
    %c0_8 = arith.constant 0 : index
    %c0_9 = arith.constant 0 : index
    %21 = vector.load %arg3[%c0_8, %c0_9] : memref<1x128xf32, #tpu.memory_space<vmem>>, vector<1x128xf32>
    %22 = vector.broadcast %21 : vector<1x128xf32> to vector<16x128xf32>
    %23 = arith.addf %20, %22 : vector<16x128xf32>
    %c0_10 = arith.constant 0 : index
    %c0_11 = arith.constant 0 : index
    %24 = vector.load %arg4[%c0_10, %c0_11] : memref<128x32xf32, #tpu.memory_space<vmem>>, vector<128x32xf32>
    %cst_12 = arith.constant dense<0.000000e+00> : vector<16x32xf32>
    %25 = tpu.matmul %23, %24, %cst_12 {dimension_numbers = #tpu.dot_dimension_numbers<[1], [0], [0], [1], [0, 0, 1, 1], [], []>} : vector<16x128xf32>, vector<128x32xf32>, vector<16x32xf32> -> vector<16x32xf32>
    %c0_13 = arith.constant 0 : index
    %c0_14 = arith.constant 0 : index
    %26 = vector.load %arg5[%c0_13, %c0_14] : memref<1x32xf32, #tpu.memory_space<vmem>>, vector<1x32xf32>
    %27 = vector.broadcast %26 : vector<1x32xf32> to vector<16x32xf32>
    %28 = arith.addf %25, %27 : vector<16x32xf32>
    %cst_15 = arith.constant 5.000000e-01 : f32
    %29 = vector.broadcast %cst_15 : f32 to vector<16x32xf32>
    %30 = arith.mulf %29, %28 : vector<16x32xf32>
    %cst_16 = arith.constant 0.707106769 : f32
    %31 = vector.broadcast %cst_16 : f32 to vector<16x32xf32>
    %32 = arith.mulf %28, %31 : vector<16x32xf32>
    %cst_17 = arith.constant 0.000000e+00 : f32
    %33 = vector.broadcast %cst_17 : f32 to vector<16x32xf32>
    %34 = arith.cmpf oge, %32, %33 : vector<16x32xf32>
    %cst_18 = arith.constant 1.000000e+00 : f32
    %cst_19 = arith.constant -1.000000e+00 : f32
    %35 = vector.broadcast %cst_18 : f32 to vector<16x32xf32>
    %36 = vector.broadcast %cst_19 : f32 to vector<16x32xf32>
    %37 = arith.select %34, %35, %36 : vector<16x32xi1>, vector<16x32xf32>
    %38 = math.absf %32 : vector<16x32xf32>
    %cst_20 = arith.constant 0.327591091 : f32
    %39 = vector.broadcast %cst_20 : f32 to vector<16x32xf32>
    %40 = arith.mulf %39, %38 : vector<16x32xf32>
    %cst_21 = arith.constant 1.000000e+00 : f32
    %41 = vector.broadcast %cst_21 : f32 to vector<16x32xf32>
    %42 = arith.addf %41, %40 : vector<16x32xf32>
    %43 = tpu.reciprocal %42 {approx = true} : vector<16x32xf32> -> vector<16x32xf32>
    %44 = arith.mulf %42, %43 : vector<16x32xf32>
    %cst_22 = arith.constant 2.000000e+00 : f32
    %45 = vector.broadcast %cst_22 : f32 to vector<16x32xf32>
    %46 = arith.subf %45, %44 : vector<16x32xf32>
    %47 = arith.mulf %43, %46 : vector<16x32xf32>
    %cst_23 = arith.constant 1.06140542 : f32
    %48 = vector.broadcast %cst_23 : f32 to vector<16x32xf32>
    %49 = arith.mulf %48, %47 : vector<16x32xf32>
    %cst_24 = arith.constant -1.45315206 : f32
    %50 = vector.broadcast %cst_24 : f32 to vector<16x32xf32>
    %51 = arith.addf %49, %50 : vector<16x32xf32>
    %52 = arith.mulf %51, %47 : vector<16x32xf32>
    %cst_25 = arith.constant 1.42141378 : f32
    %53 = vector.broadcast %cst_25 : f32 to vector<16x32xf32>
    %54 = arith.addf %52, %53 : vector<16x32xf32>
    %55 = arith.mulf %54, %47 : vector<16x32xf32>
    %cst_26 = arith.constant -0.284496725 : f32
    %56 = vector.broadcast %cst_26 : f32 to vector<16x32xf32>
    %57 = arith.addf %55, %56 : vector<16x32xf32>
    %58 = arith.mulf %57, %47 : vector<16x32xf32>
    %cst_27 = arith.constant 0.254829586 : f32
    %59 = vector.broadcast %cst_27 : f32 to vector<16x32xf32>
    %60 = arith.addf %58, %59 : vector<16x32xf32>
    %61 = arith.mulf %60, %47 : vector<16x32xf32>
    %cst_28 = arith.constant 0.000000e+00 : f32
    %62 = vector.broadcast %cst_28 : f32 to vector<16x32xf32>
    %63 = arith.subf %62, %38 : vector<16x32xf32>
    %64 = arith.mulf %63, %38 : vector<16x32xf32>
    %65 = math.exp %64 : vector<16x32xf32>
    %66 = arith.mulf %61, %65 : vector<16x32xf32>
    %cst_29 = arith.constant 1.000000e+00 : f32
    %67 = vector.broadcast %cst_29 : f32 to vector<16x32xf32>
    %68 = arith.subf %67, %66 : vector<16x32xf32>
    %69 = arith.mulf %37, %68 : vector<16x32xf32>
    %cst_30 = arith.constant 1.000000e+00 : f32
    %70 = vector.broadcast %cst_30 : f32 to vector<16x32xf32>
    %71 = arith.addf %70, %69 : vector<16x32xf32>
    %72 = arith.mulf %30, %71 : vector<16x32xf32>
    %c0_31 = arith.constant 0 : index
    %c0_32 = arith.constant 0 : index
    %73 = vector.load %arg6[%c0_31, %c0_32] : memref<32x8xf32, #tpu.memory_space<vmem>>, vector<32x8xf32>
    %cst_33 = arith.constant dense<0.000000e+00> : vector<16x8xf32>
    %74 = tpu.matmul %72, %73, %cst_33 {dimension_numbers = #tpu.dot_dimension_numbers<[1], [0], [0], [1], [0, 0, 1, 1], [], []>} : vector<16x32xf32>, vector<32x8xf32>, vector<16x8xf32> -> vector<16x8xf32>
    %c0_34 = arith.constant 0 : index
    %c0_35 = arith.constant 0 : index
    %75 = vector.load %arg7[%c0_34, %c0_35] : memref<1x8xf32, #tpu.memory_space<vmem>>, vector<1x8xf32>
    %76 = vector.broadcast %75 : vector<1x8xf32> to vector<16x8xf32>
    %77 = arith.addf %74, %76 : vector<16x8xf32>
    %78 = vector.shape_cast %77 : vector<16x8xf32> to vector<1x16x8xf32>
    %cst_36 = arith.constant dense<0xFF800000> : vector<1x8xf32>
    %79 = vector.multi_reduction <maximumf>, %78, %cst_36 [1] : vector<1x16x8xf32> to vector<1x8xf32>
    %80 = vector.shape_cast %79 : vector<1x8xf32> to vector<1x1x8xf32>
    %81 = vector.broadcast %80 : vector<1x1x8xf32> to vector<1x16x8xf32>
    %82 = arith.subf %78, %81 : vector<1x16x8xf32>
    %83 = math.exp %82 : vector<1x16x8xf32>
    %cst_37 = arith.constant dense<0.000000e+00> : vector<1x8xf32>
    %84 = vector.multi_reduction <add>, %83, %cst_37 [1] : vector<1x16x8xf32> to vector<1x8xf32>
    %85 = vector.shape_cast %84 : vector<1x8xf32> to vector<1x1x8xf32>
    %86 = tpu.reciprocal %85 {approx = true} : vector<1x1x8xf32> -> vector<1x1x8xf32>
    %87 = arith.mulf %85, %86 : vector<1x1x8xf32>
    %cst_38 = arith.constant 2.000000e+00 : f32
    %88 = vector.broadcast %cst_38 : f32 to vector<1x1x8xf32>
    %89 = arith.subf %88, %87 : vector<1x1x8xf32>
    %90 = arith.mulf %86, %89 : vector<1x1x8xf32>
    %91 = vector.broadcast %90 : vector<1x1x8xf32> to vector<1x16x8xf32>
    %92 = arith.mulf %83, %91 : vector<1x16x8xf32>
    "tpu.trace_start"() <{level = 10 : i32, message = "bnk,bnd->bkd"}> : () -> ()
    %cst_39 = arith.constant dense<0.000000e+00> : vector<1x8x128xf32>
    %93 = tpu.matmul %92, %0, %cst_39 {dimension_numbers = #tpu.dot_dimension_numbers<[1], [1], [2], [2], [0, 0, 0, 2, 1, 2], [0], [0]>} : vector<1x16x8xf32>, vector<1x16x128xf32>, vector<1x8x128xf32> -> vector<1x8x128xf32>
    "tpu.trace_stop"() : () -> ()
    %c0_40 = arith.constant 0 : index
    %c0_41 = arith.constant 0 : index
    %c0_42 = arith.constant 0 : index
    %94 = vector.load %arg8[%c0_40, %c0_41, %c0_42] : memref<1x8x128xf32, #tpu.memory_space<vmem>>, vector<1x8x128xf32>
    tpu.vector_store %arg8[%c0_40, %c0_41, %c0_42], %93 {strides = array<i32>} : memref<1x8x128xf32, #tpu.memory_space<vmem>>, vector<1x8x128xf32>,
    return
  }
  func.func @transform_0(%arg0: i32) -> (i32, i32, i32) {
    %c0_i32 = arith.constant 0 : i32
    %c0_i32_0 = arith.constant 0 : i32
    %c0_i32_1 = arith.constant 0 : i32
    return %arg0, %c0_i32, %c0_i32_0 : i32, i32, i32
  }
  func.func @transform_1(%arg0: i32) -> (i32, i32) {
    %c0_i32 = arith.constant 0 : i32
    %c0_i32_0 = arith.constant 0 : i32
    %c0_i32_1 = arith.constant 0 : i32
    return %c0_i32, %c0_i32_0 : i32, i32
  }
  func.func @transform_2(%arg0: i32) -> (i32, i32) {
    %c0_i32 = arith.constant 0 : i32
    %c0_i32_0 = arith.constant 0 : i32
    %c0_i32_1 = arith.constant 0 : i32
    return %c0_i32, %c0_i32_0 : i32, i32
  }
  func.func @transform_3(%arg0: i32) -> (i32, i32) {
    %c0_i32 = arith.constant 0 : i32
    %c0_i32_0 = arith.constant 0 : i32
    %c0_i32_1 = arith.constant 0 : i32
    return %c0_i32, %c0_i32_0 : i32, i32
  }
  func.func @transform_4(%arg0: i32) -> (i32, i32) {
    %c0_i32 = arith.constant 0 : i32
    %c0_i32_0 = arith.constant 0 : i32
    %c0_i32_1 = arith.constant 0 : i32
    return %c0_i32, %c0_i32_0 : i32, i32
  }
  func.func @transform_5(%arg0: i32) -> (i32, i32) {
    %c0_i32 = arith.constant 0 : i32
    %c0_i32_0 = arith.constant 0 : i32
    %c0_i32_1 = arith.constant 0 : i32
    return %c0_i32, %c0_i32_0 : i32, i32
  }
  func.func @transform_6(%arg0: i32) -> (i32, i32) {
    %c0_i32 = arith.constant 0 : i32
    %c0_i32_0 = arith.constant 0 : i32
    %c0_i32_1 = arith.constant 0 : i32
    return %c0_i32, %c0_i32_0 : i32, i32
  }
  func.func @transform_7(%arg0: i32) -> (i32, i32, i32) {
    %c0_i32 = arith.constant 0 : i32
    %c0_i32_0 = arith.constant 0 : i32
    %c0_i32_1 = arith.constant 0 : i32
    return %arg0, %c0_i32, %c0_i32_0 : i32, i32, i32
  }
}

</mosaic_0001>

<bundles_post_ra>
// kernel: tpu_custom_call.1
= control target key start
LH: loop header
LB: loop body
LE: loop exit
PB: predicated region body
PF: predicated region fallthrough
CT: control target
= control target key end

     0   :  { %12 = vsyncpa [#allocation3], 0  ;;  %s1904_s0 = inlined_call_operand.hbm [shape: f32[4,16,128], index: 0, kind: input, shape index: {}]   ;;  %s1905_s1 = inlined_call_operand.hbm [shape: f32[1,128], index: 1, kind: input, shape index: {}]   ;;  %s1906_s2 = inlined_call_operand.hbm [shape: f32[1,128], index: 2, kind: input, shape index: {}]   ;;  %s1907_s3 = inlined_call_operand.hbm [shape: f32[128,32], index: 3, kind: input, shape index: {}]   ;;  %s1908_s4 = inlined_call_operand.hbm [shape: f32[1,32], index: 4, kind: input, shape index: {}]   ;;  %s1909_s5 = inlined_call_operand.hbm [shape: f32[32,8], index: 5, kind: input, shape index: {}]   ;;  %s1910_s6 = inlined_call_operand.hbm [shape: f32[1,8], index: 6, kind: input, shape index: {}]   ;;  %s1911_s7 = inlined_call_operand.hbm [shape: f32[4,8,128], index: 7, kind: output, shape index: {}]  }
   0x1   :  { %14 = vsyncpa [#allocation3 + $0x1], 0 }
   0x2   :  { %15 = vsyncpa [#allocation6], 0 }
   0x3   :  { %16 = vsyncpa [#allocation9], 0 }
   0x4   :  { %17 = vsyncpa [#allocation12], 0 }
   0x5   :  { %18 = vsyncpa [#allocation4], 0 }
   0x6   :  { %20 = vsyncpa [#allocation4 + $0x1], 0  ;;  %s1566_s24 = smov 0   ;;  %s1568_s25 = smov 0  }
   0x7   :  { %s1570_s26 = smov 0   ;;  %s1572_s27 = smov 0  }
   0x8 LB: > { %s1512_s28 = smov [#allocation5]   ;;  %s1587_s30 = sadd.s32 4294967295, %s1510_s27   ;;  %s1510_s27 = sphi %s1572_s27, %s1938_s27   ;;  %s1506_s26 = sphi %s1570_s26, %s1937_s26   ;;  %s1502_s25 = sphi %s1568_s25, %s1936_s25   ;;  %s1498_s24 = sphi %s1566_s24, %s1935_s24  }
   0x9   : > { %s222_s29 = sshll.u32 %s1512_s28, 4  ;;  %p948_p0 = scmp.ge.s32.totalorder %s1510_s27, 1  ;;  %s223_s29 = int_to_ptr.vmem [resolvable:$true] %s222_s29 }
   0xa   : > { %p1912_p1 = scmp.eq.s32.totalorder %s1587_s30, 0  ;;  %p209_p2 = scmp.lt.s32.totalorder %s1510_s27, 5 }
   0xb   : > { %s1513_s9 = smov [#allocation8]   ;;  %s1514_s12 = smov [#allocation11]  }
   0xc   : > { %p1592_p3 = pnand %p948_p0, %p209_p2  ;;  %s243_s10 = sshll.u32 %s1513_s9, 4  ;;  %s1598_s10 = int_to_ptr.vmem [resolvable:$true] %s243_s10 }
   0xd   : > { %s267_s13 = sshll.u32 %s1514_s12, 4  ;;  %s1234_s16 = scalar_lea.hbm %s1905_s1, 16  ;;  %s1606_s13 = int_to_ptr.vmem [resolvable:$true] %s267_s13 }
   0xe   : > { %s1916_s8 = scalar_select %p1592_p3, 1, 0 }
   0xf   : > { %p1131_p4 = pneg %p1592_p3  ;;  %p1235_p6 = scmp.ne.s32.totalorder %s1905_s1, %s1234_s16 }
  0x10   : > { %p1241_p10 = scmp.lt.u32.totalorder %s1234_s16, %s1905_s1 }
  0x11   : > { %p1602_p5 = pnand %p1131_p4, %p1912_p1 }
  0x13   : > { %p1616_p7 = pneg %p1602_p5 }
  0x15   : > { %p1237_p8 = pnand %p1616_p7, %p1235_p6 }
  0x17   : > { %p1238_p9 = pneg %p1237_p8 }
  0x19   : > { %p1243_p11 = pnand %p1241_p10, %p1238_p9 }
  0x1b   : > { %1246 = shalt.err (!%p1243_p11)
}
  0x1c   : > { %s1247_s22 = scalar_lea.vmem %s223_s29, 16  ;;  %s1254_s23 = scalar_lea.vmem %s223_s29, 32 }
  0x1d   : > { %p1248_p12 = scmp.ne.s32.totalorder %s223_s29, %s1247_s22  ;;  %p1255_p2 = scmp.lt.s32.totalorder %s223_s29, %s223_s29 }
  0x1e   : > { %p1256_p4 = scmp.lt.s32.totalorder %s1254_s23, %s1247_s22 }
  0x1f   : > { %p1250_p13 = pnand %p1248_p12, %p1616_p7 }
  0x20   : > { %p1257_p1 = por %p1256_p4, %p1255_p2 }
  0x21   : > { %p1251_p0 = pneg %p1250_p13 }
  0x23   : > { %p1258_p3 = pnand %p1257_p1, %p1251_p0 }
  0x25   : > { %1261 = shalt.err (!%p1258_p3)
}
  0x26   : > { %1134 = dma.hbm_to_vmem [thread:$0]  (!%p1602_p5), %s1905_s1, 16, %s223_s29, [#allocation6]  }
  0x27   : > { %s1262_s15 = scalar_lea.hbm %s1907_s3, 2048 }
  0x28   : > { %p1263_p6 = scmp.ne.s32.totalorder %s1907_s3, %s1262_s15  ;;  %p1269_p1 = scmp.lt.u32.totalorder %s1262_s15, %s1907_s3 }
  0x2a   : > { %p1265_p8 = pnand %p1263_p6, %p1616_p7 }
  0x2c   : > { %p1266_p9 = pneg %p1265_p8 }
  0x2e   : > { %p1271_p3 = pnand %p1269_p1, %p1266_p9 }
  0x30   : > { %1274 = shalt.err (!%p1271_p3)
}
  0x31   : > { %s1275_s29 = scalar_lea.vmem %s1598_s10, 2048  ;;  %p1283_p13 = scmp.lt.s32.totalorder %s1598_s10, %s1598_s10 }
  0x32   : > { %p1276_p10 = scmp.ne.s32.totalorder %s1598_s10, %s1275_s29  ;;  %p1284_p0 = scmp.lt.s32.totalorder %s1275_s29, %s1275_s29 }
  0x34   : > { %p1278_p11 = pnand %p1276_p10, %p1616_p7  ;;  %p1285_p2 = por %p1284_p0, %p1283_p13 }
  0x36   : > { %p1279_p12 = pneg %p1278_p11 }
  0x38   : > { %p1286_p4 = pnand %p1285_p2, %p1279_p12 }
  0x3a   : > { %1289 = shalt.err (!%p1286_p4)
}
  0x3b   : > { %s1914_s21 = smov 128   ;;  %s1516_s22 = smov 8  }
  0x3c   : > { %1140 = dma.hbm_to_vmem [thread:$0]  (!%p1602_p5), %s1907_s3, 2048, %s1598_s10, [#allocation9], %s1914_s21, %s1914_s21, %s1516_s22  }
  0x3d   : > { %s1290_s14 = scalar_lea.hbm %s1909_s5, 512 }
  0x3e   : > { %p1291_p6 = scmp.ne.s32.totalorder %s1909_s5, %s1290_s14  ;;  %p1297_p1 = scmp.lt.u32.totalorder %s1290_s14, %s1909_s5 }
  0x40   : > { %p1293_p8 = pnand %p1291_p6, %p1616_p7 }
  0x42   : > { %p1294_p9 = pneg %p1293_p8 }
  0x44   : > { %p1299_p3 = pnand %p1297_p1, %p1294_p9 }
  0x46   : > { %1302 = shalt.err (!%p1299_p3)
}
  0x47   : > { %s1303_s10 = scalar_lea.vmem %s1606_s13, 512  ;;  %p1311_p13 = scmp.lt.s32.totalorder %s1606_s13, %s1606_s13 }
  0x48   : > { %p1304_p10 = scmp.ne.s32.totalorder %s1606_s13, %s1303_s10  ;;  %p1312_p0 = scmp.lt.s32.totalorder %s1303_s10, %s1303_s10 }
  0x4a   : > { %p1306_p11 = pnand %p1304_p10, %p1616_p7  ;;  %p1313_p2 = por %p1312_p0, %p1311_p13 }
  0x4c   : > { %p1307_p12 = pneg %p1306_p11 }
  0x4e   : > { %p1314_p4 = pnand %p1313_p2, %p1307_p12 }
  0x50   : > { %1317 = shalt.err (!%p1314_p4)
}
  0x51   : > { %1146 = dma.hbm_to_vmem [thread:$0]  (!%p1602_p5), %s1909_s5, 512, %s1606_s13, [#allocation12], %s1914_s21, %s1914_s21, %s1516_s22  }
  0x52   : > { %s1517_s23 = smov [#allocation7]   ;;  %s1518_s9 = smov [#allocation10]  }
  0x53   : > { %s233_s28 = sshll.u32 %s1517_s23, 4  ;;  %s257_s12 = sshll.u32 %s1518_s9, 4  ;;  %s234_s28 = int_to_ptr.vmem [resolvable:$true] %s233_s28  ;;  %s258_s12 = int_to_ptr.vmem [resolvable:$true] %s257_s12 }
  0x54   : > { %s1318_s16 = scalar_lea.hbm %s1906_s2, 16 }
  0x55   : > { %p1319_p6 = scmp.ne.s32.totalorder %s1906_s2, %s1318_s16  ;;  %p1325_p1 = scmp.lt.u32.totalorder %s1318_s16, %s1906_s2 }
  0x57   : > { %p1321_p8 = pnand %p1319_p6, %p1616_p7 }
  0x59   : > { %p1322_p9 = pneg %p1321_p8 }
  0x5b   : > { %p1327_p3 = pnand %p1325_p1, %p1322_p9 }
  0x5d   : > { %1330 = shalt.err (!%p1327_p3)
}
  0x5e   : > { %s1331_s13 = scalar_lea.vmem %s234_s28, 16  ;;  %s1338_s29 = scalar_lea.vmem %s234_s28, 32 }
  0x5f   : > { %p1332_p10 = scmp.ne.s32.totalorder %s234_s28, %s1331_s13  ;;  %p1339_p13 = scmp.lt.s32.totalorder %s234_s28, %s234_s28 }
  0x60   : > { %p1340_p0 = scmp.lt.s32.totalorder %s1338_s29, %s1331_s13 }
  0x61   : > { %p1334_p11 = pnand %p1332_p10, %p1616_p7 }
  0x62   : > { %p1341_p2 = por %p1340_p0, %p1339_p13 }
  0x63   : > { %p1335_p12 = pneg %p1334_p11 }
  0x65   : > { %p1342_p4 = pnand %p1341_p2, %p1335_p12 }
  0x67   : > { %1345 = shalt.err (!%p1342_p4)
}
  0x68   : > { %1137 = dma.hbm_to_vmem [thread:$0]  (!%p1602_p5), %s1906_s2, 16, %s234_s28, [#allocation6]  }
  0x69   : > { %s1346_s16 = scalar_lea.hbm %s1908_s4, 16 }
  0x6a   : > { %p1347_p6 = scmp.ne.s32.totalorder %s1908_s4, %s1346_s16  ;;  %p1353_p1 = scmp.lt.u32.totalorder %s1346_s16, %s1908_s4 }
  0x6c   : > { %p1349_p8 = pnand %p1347_p6, %p1616_p7 }
  0x6e   : > { %p1350_p9 = pneg %p1349_p8 }
  0x70   : > { %p1355_p3 = pnand %p1353_p1, %p1350_p9 }
  0x72   : > { %1358 = shalt.err (!%p1355_p3)
}
  0x73   : > { %s1359_s13 = scalar_lea.vmem %s258_s12, 16  ;;  %s1366_s28 = scalar_lea.vmem %s258_s12, 32 }
  0x74   : > { %p1360_p10 = scmp.ne.s32.totalorder %s258_s12, %s1359_s13  ;;  %p1367_p13 = scmp.lt.s32.totalorder %s258_s12, %s258_s12 }
  0x75   : > { %p1368_p0 = scmp.lt.s32.totalorder %s1366_s28, %s1359_s13 }
  0x76   : > { %p1362_p11 = pnand %p1360_p10, %p1616_p7 }
  0x77   : > { %p1369_p2 = por %p1368_p0, %p1367_p13 }
  0x78   : > { %p1363_p12 = pneg %p1362_p11 }
  0x7a   : > { %p1370_p4 = pnand %p1369_p2, %p1363_p12 }
  0x7c   : > { %1373 = shalt.err (!%p1370_p4)
}
  0x7d   : > { %1143 = dma.hbm_to_vmem [thread:$0]  (!%p1602_p5), %s1908_s4, 16, %s258_s12, [#allocation9]  }
  0x7e   : > { %s1519_s9 = smov [#allocation13]   ;;  %s1374_s17 = scalar_lea.hbm %s1910_s6, 16 }
  0x7f   : > { %s281_s14 = sshll.u32 %s1519_s9, 4  ;;  %p1375_p6 = scmp.ne.s32.totalorder %s1910_s6, %s1374_s17  ;;  %s282_s14 = int_to_ptr.vmem [resolvable:$true] %s281_s14 }
  0x80   : > { %p1381_p1 = scmp.lt.u32.totalorder %s1374_s17, %s1910_s6 }
  0x81   : > { %p1377_p8 = pnand %p1375_p6, %p1616_p7 }
  0x83   : > { %p1378_p9 = pneg %p1377_p8 }
  0x85   : > { %p1383_p3 = pnand %p1381_p1, %p1378_p9 }
  0x87   : > { %1386 = shalt.err (!%p1383_p3)
}
  0x88   : > { %s1387_s12 = scalar_lea.vmem %s282_s14, 16  ;;  %s1394_s28 = scalar_lea.vmem %s282_s14, 32 }
  0x89   : > { %p1388_p10 = scmp.ne.s32.totalorder %s282_s14, %s1387_s12  ;;  %p1395_p13 = scmp.lt.s32.totalorder %s282_s14, %s282_s14 }
  0x8a   : > { %p1396_p0 = scmp.lt.s32.totalorder %s1394_s28, %s1387_s12 }
  0x8b   : > { %p1390_p11 = pnand %p1388_p10, %p1616_p7 }
  0x8c   : > { %p1397_p2 = por %p1396_p0, %p1395_p13 }
  0x8d   : > { %p1391_p12 = pneg %p1390_p11 }
  0x8f   : > { %p1398_p4 = pnand %p1397_p2, %p1391_p12 }
  0x91   : > { %1401 = shalt.err (!%p1398_p4)
}
  0x92   : > { %1149 = dma.hbm_to_vmem [thread:$0]  (!%p1602_p5), %s1910_s6, 16, %s282_s14, [#allocation12]  }
  0x93   : > { %s947_s19 = sadd.s32 4294967294, %s1510_s27   ;;  %s1740_s11 = sadd.s32 1, %s1510_s27  }
  0x94   : > { %s30_s9 = ssub.s32 %s1510_s27, %s1740_s11  ;;  %s33_s15 = sadd.s32 1, %s1506_s26 }
  0x95   : > { %p31_p7 = scmp.eq.s32.totalorder %s30_s9, 0  ;;  %p40_p6 = scmp.ne.s32.totalorder %s1506_s26, %s1502_s25 }
  0x96   : > { %p41_p8 = scmp.eq.s32.totalorder %s1510_s27, 0  ;;  %p46_p9 = scmp.ne.s32.totalorder %s1502_s25, %s1498_s24 }
  0x97   : > { %s1751_s16 = scalar_select %p31_p7, %s1506_s26, %s33_s15  }
  0x98   : > { %p1753_p1 = por %p41_p8, %p40_p6  ;;  %p1920_p3 = scmp.eq.s32.totalorder %s1587_s30, 0 }
  0x99   : > { %p196_p10 = scmp.eq.s32.totalorder %s1587_s30, 3  ;;  %p202_p11 = scmp.eq.s32.totalorder %s947_s19, 3 }
  0x9a   : > { %p1759_p5 = por %p1920_p3, %p46_p9  ;;  %p1164_p12 = scmp.lt.s32.totalorder %s1510_s27, 4 }
  0x9b   : > { %s292_s18 = sand.u32 1, %s1506_s26   ;;  %p1766_p13 = por %p196_p10, %p40_p6 }
  0x9c   : > { %p1770_p0 = por %p202_p11, %p46_p9  ;;  %s956_s13 = sshll.u32 %s292_s18, 4 }
  0x9d   : > { %s1922_s10 = scalar_select %p1766_p13, 1, 0 }
  0x9e   : > { %s1923_s20 = scalar_select %p1770_p0, 1, 0 }
  0x9f   : > { %s979_s12 = sshll.u32 %s1510_s27, 8  ;;  %s296_s19 = scalar_lea.vmem [#allocation2], %s956_s13 }
  0xa0   : > { %s1778_s23 = scalar_lea.hbm %s1904_s0, %s979_s12  ;;  %s303_s9 = sshll.u32 %s296_s19, 4  ;;  %s1780_s9 = int_to_ptr.vmem [resolvable:$true] %s303_s9 }
  0xa1   : > { %p1784_p2 = pnand %p1164_p12, %p1753_p1  ;;  %s1788_s21 = scalar_lea.sflag [#allocation3], %s292_s18 }
  0xa2   : > { %s1402_s28 = scalar_lea.hbm %s1778_s23, 256  ;;  %s1407_s17 = scalar_lea.hbm %s1904_s0, 1024 }
  0xa3   : > { %p1403_p4 = scmp.ne.s32.totalorder %s1778_s23, %s1402_s28  ;;  %p1404_p7 = pneg %p1784_p2 }
  0xa4   : > { %p1408_p9 = scmp.lt.u32.totalorder %s1778_s23, %s1904_s0  ;;  %p1409_p1 = scmp.lt.u32.totalorder %s1407_s17, %s1402_s28 }
  0xa5   : > { %p1405_p6 = pnand %p1404_p7, %p1403_p4  ;;  %p1411_p10 = scmp.lt.u32.totalorder %s1402_s28, %s1778_s23 }
  0xa6   : > { %p1410_p3 = por %p1409_p1, %p1408_p9 }
  0xa7   : > { %p1406_p8 = pneg %p1405_p6 }
  0xa8   : > { %p1412_p11 = por %p1411_p10, %p1410_p3 }
  0xaa   : > { %p1413_p12 = pnand %p1412_p11, %p1406_p8 }
  0xac   : > { %1416 = shalt.err (!%p1413_p12)
}
  0xad   : > { %s1417_s18 = scalar_lea.vmem %s1780_s9, 256  ;;  %s1520_s13 = smov [#allocation2]  }
  0xae   : > { %p1418_p4 = scmp.ne.s32.totalorder %s1780_s9, %s1417_s18  ;;  %s1422_s12 = sshll.u32 %s1520_s13, 4  ;;  %s1423_s12 = int_to_ptr.vmem [resolvable:$false] %s1422_s12 }
  0xaf   : > { %s1424_s29 = scalar_lea.vmem %s1423_s12, 512  ;;  %p1425_p13 = scmp.lt.s32.totalorder %s1780_s9, %s1423_s12 }
  0xb0   : > { %p1420_p6 = pnand %p1418_p4, %p1404_p7  ;;  %p1426_p9 = scmp.lt.s32.totalorder %s1424_s29, %s1417_s18 }
  0xb2   : > { %p1421_p0 = pneg %p1420_p6  ;;  %p1427_p1 = por %p1426_p9, %p1425_p13 }
  0xb4   : > { %p1428_p3 = pnand %p1427_p1, %p1421_p0 }
  0xb6   : > { %1431 = shalt.err (!%p1428_p3)
}
  0xb7   : > { %s1925_s28 = smov 128   ;;  %p1926_p7 = scmp.ne.s32.totalorder %s1916_s8, 0 }
  0xb8   : > { %1153 = dma.hbm_to_vmem [thread:$0]  (!%p1784_p2), %s1778_s23, 256, %s1780_s9, %s1788_s21, %s1925_s28, %s1925_s28, %s1516_s22  }
  0xb9   : > { %315 = sbr.rel (%p1926_p7) target bundleno = 1423 (0x58f), region = 48  ;;  %s1822_s17 = sand.u32 (!%p1926_p7), 1, %s1502_s25  }
  0xba   : > { %s960_s19 = sshll.u32 (!%p1926_p7), %s1822_s17, 4  ;;  %s318_s18 = scalar_lea.sflag (!%p1926_p7), [#allocation3], %s1822_s17 }
  0xbb   : > { %s321_s13 = scalar_lea.vmem (!%p1926_p7), [#allocation2], %s960_s19 }
  0xc0   : > { %1477 = dma.done.wait (%p1759_p5), %s318_s18, 256  }
  0xc1   : > { %1479 = vsyncadd (%p1759_p5), %s318_s18, 4294967040  ;;  %p1927_p13 = scmp.eq.s32.totalorder %s1587_s30, 0 }
  0xc3   : > { %1481 = dma.done.wait (%p1927_p13), [#allocation6], 32   ;;  %p1928_p0 = pmov %p1927_p13 }
  0xc5   : > { %1483 = vsyncadd (%p1928_p0), [#allocation6], 4294967264  ;;  %p1929_p2 = pmov %p1928_p0 }
  0xc6   : > { %p1930_p8 = pmov %p1928_p0 }
  0xc7   : > { %1485 = dma.done.wait (%p1929_p2), [#allocation9], 2064  }
  0xc8   : > { %1487 = vsyncadd (%p1930_p8), [#allocation9], 4294965232  ;;  %p1931_p10 = pmov %p1928_p0 }
  0xc9   : > { %p1932_p11 = pmov %p1928_p0 }
  0xca   : > { %1489 = dma.done.wait (%p1931_p10), [#allocation12], 528  }
  0xcb   : > { %1491 = vsyncadd (%p1932_p11), [#allocation12], 4294966768  ;;  %v1842_v0 = vld [vmem:[%s321_s13] sm:$0xff]  ;;  %v1845_v1 = vld [vmem:[%s321_s13 + $0x8] sm:$0xff]  ;;  %vm586_vm2 = vcmask 261120   ;;  %vm1523_vm3 = vmmov 0  }
  0xcc   : > { %378 = vadd.xlane.f32.xlu0 %v1842_v0  ;;  %v419_v2 = vld [vmem:[#allocation8] sm:$0xff]  ;;  %v420_v3 = vld [vmem:[#allocation8 + $0x8] sm:$0xff]  ;;  %v421_v4 = vld [vmem:[#allocation8 + $0x10] sm:$0xff]  ;;  %vm668_vm4 = vcmask 64512   ;;  %vm731_vm5 = vcmask 130048   ;;  %s967_s8 = sshll.u32 %s1822_s17, 3 }
  0xcd   : > { %v1060_v5 = vpack.c.bf16 %v420_v3, %v419_v2  ;;  %v422_v6 = vld [vmem:[#allocation8 + $0x18] sm:$0xff]  ;;  %v423_v16 = vld [vmem:[#allocation8 + $0x20] sm:$0xff]  ;;  %v424_v17 = vld [vmem:[#allocation8 + $0x28] sm:$0xff]  ;;  %s375_s21 = scalar_lea.vmem [#allocation14], %s967_s8  ;;  %s976_s14 = sshll.u32 %s1587_s30, 7 }
  0xce   : > { %v1064_v7 = vpack.c.bf16 %v422_v6, %v421_v4  ;;  %v1068_v18 = vpack.c.bf16 %v424_v17, %v423_v16  ;;  %v425_v19 = vld [vmem:[#allocation8 + $0x30] sm:$0xff]  ;;  %v426_v20 = vld [vmem:[#allocation8 + $0x38] sm:$0xff]  ;;  %v427_v22 = vld [vmem:[#allocation8 + $0x40] sm:$0xff]  ;;  %s820_s22 = sshll.u32 %s375_s21, 4  ;;  %s1863_s15 = scalar_lea.hbm %s1911_s7, %s976_s14  ;;  %s1858_s22 = int_to_ptr.vmem [resolvable:$true] %s820_s22 }
  0xcf   : > { %1061 = vmatprep.subr.bf16.mxu0 %v1060_v5  ;;  %v1072_v21 = vpack.c.bf16 %v426_v20, %v425_v19  ;;  %v428_v23 = vld [vmem:[#allocation8 + $0x48] sm:$0xff]  ;;  %v429_v25 = vld [vmem:[#allocation8 + $0x50] sm:$0xff]  ;;  %v430_v26 = vld [vmem:[#allocation8 + $0x58] sm:$0xff]  ;;  %s807_s12 = scalar_lea.sflag [#allocation4], %s1822_s17  ;;  %s1432_s29 = scalar_lea.vmem %s1858_s22, 128 }
  0xd0   : > { %380 = vadd.xlane.f32.xlu0 %v1845_v1  ;;  %1063 = vmatpush3.bf16.msra.mxu0 %v1060_v5  ;;  %v1076_v24 = vpack.c.bf16 %v428_v23, %v427_v22  ;;  %v431_v27 = vld [vmem:[#allocation8 + $0x60] sm:$0xff]  ;;  %v1080_v28 = vpack.c.bf16 %v430_v26, %v429_v25  ;;  %v432_v29 = vld [vmem:[#allocation8 + $0x68] sm:$0xff]  ;;  %v433_v31 = vld [vmem:[#allocation8 + $0x70] sm:$0xff]  ;;  %p1433_p5 = scmp.ne.s32.totalorder %s1858_s22, %s1432_s29  ;;  %p1933_p12 = scmp.ne.s32.totalorder %s1922_s10, 0 }
  0xd1   : > { %1065 = vmatprep.subr.bf16.mxu0 %v1064_v7  ;;  %v1084_v30 = vpack.c.bf16 %v432_v29, %v431_v27  ;;  %v434_v32 = vld [vmem:[#allocation8 + $0x78] sm:$0xff]  ;;  %v575_v50 = vld [vmem:[#allocation11] sm:$0xff]  ;;  %v576_v51 = vld [vmem:[#allocation11 + $0x8] sm:$0xff]  ;;  %s1525_s30 = smov [#allocation14]  }
  0xd2   : > { %v1088_v33 = vpack.c.bf16 %v434_v32, %v433_v31  ;;  %v968_v41 = vld [vmem:[#allocation5] ss:$0 sm:$0xff]  ;;  %v969_v43 = vld [vmem:[#allocation7] ss:$0 sm:$0xff]  ;;  %v1092_v52 = vpack.c.bf16 %v576_v51, %v575_v50  ;;  %v577_v53 = vld [vmem:[#allocation11 + $0x10] sm:$0xff]  ;;  %p1434_p4 = pnand %p1433_p5, %p1933_p12  ;;  %s1436_s28 = sshll.u32 %s1525_s30, 4  ;;  %s1437_s28 = int_to_ptr.vmem [resolvable:$false] %s1436_s28 }
  0xd3   : > { %v578_v54 = vld [vmem:[#allocation11 + $0x18] sm:$0xff]  ;;  %s1438_s19 = scalar_lea.vmem %s1437_s28, 256  ;;  %p1439_p9 = scmp.lt.s32.totalorder %s1858_s22, %s1437_s28 }
  0xd4   : > { %1067 = vmatpush3.bf16.msra.mxu0 %v1064_v7  ;;  %1093 = vmatprep.subr.bf16.mxu1 %v1092_v52  ;;  %v1096_v55 = vpack.c.bf16 %v578_v54, %v577_v53  ;;  %v970_v56 = vld [vmem:[#allocation10] ss:$0 sm:$0xff]  ;;  %p1435_p6 = pneg %p1434_p4  ;;  %p1440_p1 = scmp.lt.s32.totalorder %s1438_s19, %s1432_s29 }
  0xd5   : > { %1069 = vmatprep.subr.bf16.mxu0 %v1068_v18  ;;  %1095 = vmatpush3.bf16.msra.mxu1 %v1092_v52 }
  0xd6   : > { %1097 = vmatprep.subr.bf16.mxu1 %v1096_v55  ;;  %p1441_p3 = por %p1440_p1, %p1439_p9 }
  0xd8   : > { %1071 = vmatpush3.bf16.msra.mxu0 %v1068_v18  ;;  %p1442_p7 = pnand %p1441_p3, %p1435_p6 }
  0xd9   : > { %1073 = vmatprep.subr.bf16.mxu0 %v1072_v21  ;;  %1099 = vmatpush3.bf16.msra.mxu1 %v1096_v55 }
  0xdc   : > { %1075 = vmatpush3.bf16.msra.mxu0 %v1072_v21 }
  0xdd   : > { %1077 = vmatprep.subr.bf16.mxu0 %v1076_v24 }
  0xe0   : > { %1079 = vmatpush3.bf16.msra.mxu0 %v1076_v24 }
  0xe1   : > { %1081 = vmatprep.subr.bf16.mxu0 %v1080_v28 }
  0xe4   : > { %1083 = vmatpush3.bf16.msra.mxu0 %v1080_v28 }
  0xe5   : > { %1085 = vmatprep.subr.bf16.mxu0 %v1084_v30 }
  0xe8   : > { %1087 = vmatpush3.bf16.msra.mxu0 %v1084_v30 }
  0xe9   : > { %1089 = vmatprep.subr.bf16.mxu0 %v1088_v33 }
  0xec   : > { %1091 = vmatpush3.bf16.msra.mxu0 %v1088_v33 }
 0x159   : > { %v379_v8 = vpop.xlane.xlu0 %378 }
 0x15a   : > { %v383_v9 = vmul.f32 0.0078125, %v379_v8 }
 0x15c   : > { %v385_v10 = vsub.f32 %v1842_v0, %v383_v9 }
 0x15d   : > { %v381_v11 = vpop.xlane.xlu0 %380 }
 0x15e   : > { %v384_v12 = vmul.f32 0.0078125, %v381_v11  ;;  %v387_v13 = vmul.f32 %v385_v10, %v385_v10 }
 0x160   : > { %v386_v14 = vsub.f32 %v1845_v1, %v384_v12  ;;  %389 = vadd.xlane.f32.xlu1 %v387_v13 }
 0x162   : > { %v388_v15 = vmul.f32 %v386_v14, %v386_v14 }
 0x164   : > { %391 = vadd.xlane.f32.xlu1 %v388_v15 }
 0x1ed   : > { %v390_v34 = vpop.xlane.xlu1 %389 }
 0x1ee   : > { %v393_v35 = vmul.f32 0.0078125, %v390_v34 }
 0x1f0   : > { %v395_v36 = vadd.f32 1e-05, %v393_v35 }
 0x1f1   : > { %v392_v37 = vpop.xlane.xlu1 %391 }
 0x1f2   : > { %1216 = vrsqrt.f32 %v395_v36  ;;  %v394_v38 = vmul.f32 0.0078125, %v392_v37 }
 0x1f4   : > { %v396_v39 = vadd.f32 1e-05, %v394_v38 }
 0x1f6   : > { %1218 = vrsqrt.f32 %v396_v39 }
 0x1fc   : > { %v1217_v40 = vpop.eup %1216 }
 0x1fd   : > { %v399_v42 = vmul.f32 %v1217_v40, %v385_v10 }
 0x1ff   : > { %v408_v44 = vmul.f32 %v968_v41, %v399_v42 }
 0x200   : > { %v1219_v45 = vpop.eup %1218 }
 0x201   : > { %v400_v46 = vmul.f32 %v1219_v45, %v386_v14  ;;  %v417_v47 = vadd.f32 %v969_v43, %v408_v44  ;;  %v1521_v44 = vmov -1.0  }
 0x203   : > { %v409_v48 = vmul.f32 %v968_v41, %v400_v46  ;;  %1039 = vmatprep.mubr.f32.mxu0 %v417_v47 }
 0x205   : > { %v418_v49 = vadd.f32 %v969_v43, %v409_v48 }
 0x207   : > { %1040 = vmatmul.mubr.f32.vlgmr.msra.gmra.mrb[0].mxu0 %v418_v49 }
 0x2da   : > { %v1041_v57 = vpop.f32.mrb[0].mxu0 }
 0x2db   : > { %v514_v58 = vadd.f32 %v1041_v57, %v970_v56  ;;  %v508_v59 = vpop.f32.mrb[1].mxu0  ;;  %v1522_v57 = vmov 0.0|0.0  }
 0x2dc   : > { %v509_v60 = vadd.f32 %v970_v56, %v508_v59  ;;  %v1101_v56 = vpack.c.bf16 %v1845_v1, %v1842_v0  ;;  %1100 = vmatprep.subr.bf16.mxu1 %v1522_v57  ;;  %v1524_v59 = vmov 0.0  }
 0x2dd   : > { %v520_v61 = vmul.f32 0.70710677, %v514_v58  ;;  %v518_v53 = vmul.f32 0.5, %v514_v58 }
 0x2de   : > { %v519_v62 = vmul.f32 0.70710677, %v509_v60  ;;  %v517_v51 = vmul.f32 0.5, %v509_v60 }
 0x2df   : > { %v526_v63 = vand.u32 2147483647, %v520_v61  ;;  %vm522_vm0 = vcmp.ge.f32.partialorder %v520_v61, 0.0  ;;  %v971_v61 = vld [vmem:[#allocation13] ss:$0 sm:$0xff] }
 0x2e0   : > { %v525_v2 = vand.u32 2147483647, %v519_v62  ;;  %vm521_vm1 = vcmp.ge.f32.partialorder %v519_v62, 0.0  ;;  %v524_v45 = vsel %vm522_vm0, 1.0, %v1521_v44 }
 0x2e1   : > { %v528_v3 = vmul.f32 0.3275911, %v526_v63  ;;  %v558_v10 = vsub.f32 0.0, %v526_v63  ;;  %v523_v48 = vsel %vm521_vm1, 1.0, %v1521_v44 }
 0x2e2   : > { %v527_v4 = vmul.f32 0.3275911, %v525_v2  ;;  %v557_v13 = vsub.f32 0.0, %v525_v2 }
 0x2e3   : > { %v530_v5 = vadd.f32 1.0, %v528_v3  ;;  %v560_v16 = vmul.f32 %v558_v10, %v526_v63 }
 0x2e4   : > { %v529_v6 = vadd.f32 1.0, %v527_v4  ;;  %v559_v19 = vmul.f32 %v557_v13, %v525_v2 }
 0x2e5   : > { %1220 = vrcp.f32 %v530_v5  ;;  %v563_v22 = vmul.f32 1.442695, %v560_v16 }
 0x2e6   : > { %1222 = vrcp.f32 %v529_v6  ;;  %v561_v25 = vmul.f32 1.442695, %v559_v19 }
 0x2e7   : > { %1224 = vpow2.f32 %v563_v22 }
 0x2e8   : > { %1226 = vpow2.f32 %v561_v25 }
 0x2ef   : > { %v1221_v7 = vpop.eup %1220 }
 0x2f0   : > { %v1223_v8 = vpop.eup %1222  ;;  %v534_v9 = vmul.f32 %v1221_v7, %v530_v5 }
 0x2f1   : > { %v533_v11 = vmul.f32 %v1223_v8, %v529_v6  ;;  %v1225_v38 = vpop.eup %1224 }
 0x2f2   : > { %v536_v12 = vsub.f32 2.0, %v534_v9  ;;  %v1227_v40 = vpop.eup %1226 }
 0x2f3   : > { %v535_v14 = vsub.f32 2.0, %v533_v11 }
 0x2f4   : > { %v538_v15 = vmul.f32 %v1221_v7, %v536_v12 }
 0x2f5   : > { %v537_v17 = vmul.f32 %v1223_v8, %v535_v14 }
 0x2f6   : > { %v540_v18 = vmul.f32 1.0614054, %v538_v15 }
 0x2f7   : > { %v539_v20 = vmul.f32 1.0614054, %v537_v17 }
 0x2f8   : > { %v542_v21 = vadd.f32 -1.4531521, %v540_v18 }
 0x2f9   : > { %v541_v23 = vadd.f32 -1.4531521, %v539_v20 }
 0x2fa   : > { %v544_v24 = vmul.f32 %v542_v21, %v538_v15 }
 0x2fb   : > { %v543_v26 = vmul.f32 %v541_v23, %v537_v17 }
 0x2fc   : > { %v546_v27 = vadd.f32 1.4214138, %v544_v24 }
 0x2fd   : > { %v545_v28 = vadd.f32 1.4214138, %v543_v26 }
 0x2fe   : > { %v548_v29 = vmul.f32 %v546_v27, %v538_v15 }
 0x2ff   : > { %v547_v30 = vmul.f32 %v545_v28, %v537_v17 }
 0x300   : > { %v550_v31 = vadd.f32 -0.28449672, %v548_v29 }
 0x301   : > { %v549_v32 = vadd.f32 -0.28449672, %v547_v30 }
 0x302   : > { %v552_v33 = vmul.f32 %v550_v31, %v538_v15 }
 0x303   : > { %v551_v34 = vmul.f32 %v549_v32, %v537_v17 }
 0x304   : > { %v554_v35 = vadd.f32 0.2548296, %v552_v33 }
 0x305   : > { %v553_v36 = vadd.f32 0.2548296, %v551_v34 }
 0x306   : > { %v556_v37 = vmul.f32 %v554_v35, %v538_v15 }
 0x307   : > { %v555_v39 = vmul.f32 %v553_v36, %v537_v17 }
 0x308   : > { %v566_v41 = vmul.f32 %v1225_v38, %v556_v37 }
 0x309   : > { %v565_v42 = vmul.f32 %v1227_v40, %v555_v39 }
 0x30a   : > { %v568_v43 = vsub.f32 1.0, %v566_v41 }
 0x30b   : > { %v567_v46 = vsub.f32 1.0, %v565_v42 }
 0x30c   : > { %v570_v47 = vmul.f32 %v568_v43, %v524_v45 }
 0x30d   : > { %v569_v49 = vmul.f32 %v567_v46, %v523_v48 }
 0x30e   : > { %v572_v50 = vadd.f32 1.0, %v570_v47 }
 0x30f   : > { %v571_v52 = vadd.f32 1.0, %v569_v49 }
 0x310   : > { %v574_v55 = vmul.f32 %v572_v50, %v518_v53 }
 0x311   : > { %v573_v54 = vmul.f32 %v571_v52, %v517_v51 }
 0x313   : > { %1050 = vmatprep.mubr.msk.f32.mxu1 %vm586_vm2, %v573_v54 }
 0x314   : > { %1051 = vmatmul.mubr.msk.f32.vlgmr.msra.gmra.mrb[0].mxu1 %vm586_vm2, %v574_v55 }
 0x315   : > { %1057 = vmatprep.mubr.msk.f32.mxu1 %vm1523_vm3, %v1524_v59  ;;  %1102 = vmatpush3.bf16.msra.mxu1 %v1101_v56 }
 0x3e7   : > { %v1052_v62 = vpop.f32.mrb[0].mxu1 }
 0x3e8   : > { %v665_v60 = vadd.f32 %v1052_v62, %v971_v61  ;;  %v659_v63 = vpop.f32.mrb[1].mxu1 }
 0x3e9   : > { %v660_v58 = vadd.f32 %v971_v61, %v659_v63 }
 0x3ea   : > { %v670_v2 = vsel %vm668_vm4, %v665_v60, -inf }
 0x3eb   : > { %v669_v3 = vsel %vm668_vm4, %v660_v58, -inf }
 0x3ec   : > { %v671_v4 = vmax.f32 %v669_v3, %v670_v2 }
 0x3ee   : > { %v672_v5 = vrot.slane %v671_v4, 4 }
 0x3f0   : > { %v673_v6 = vmax.f32 %v671_v4, %v672_v5 }
 0x3f2   : > { %v674_v0 = vrot.slane %v673_v6, 2 }
 0x3f4   : > { %v675_v1 = vmax.f32 %v673_v6, %v674_v0 }
 0x3f6   : > { %v676_v7 = vrot.slane %v675_v1, 1 }
 0x3f8   : > { %v677_v8 = vmax.f32 %v675_v1, %v676_v7 }
 0x3fa   : > { %v678_v9 = vsub.f32 %v660_v58, %v677_v8  ;;  %v679_v10 = vsub.f32 %v665_v60, %v677_v8 }
 0x3fc   : > { %v680_v11 = vmul.f32 1.442695, %v678_v9  ;;  %v682_v12 = vmul.f32 1.442695, %v679_v10 }
 0x3fe   : > { %1228 = vpow2.f32 %v680_v11 }
 0x3ff   : > { %1230 = vpow2.f32 %v682_v12 }
 0x408   : > { %v1229_v13 = vpop.eup %1228 }
 0x409   : > { %v1231_v14 = vpop.eup %1230  ;;  %v684_v15 = vsel %vm668_vm4, %v1229_v13, 0.0 }
 0x40a   : > { %v685_v16 = vsel %vm668_vm4, %v1231_v14, 0.0 }
 0x40b   : > { %v686_v17 = vadd.f32 %v685_v16, %v684_v15 }
 0x40d   : > { %v687_v18 = vrot.slane %v686_v17, 4 }
 0x40f   : > { %v688_v19 = vadd.f32 %v687_v18, %v686_v17 }
 0x411   : > { %v689_v20 = vrot.slane %v688_v19, 2 }
 0x413   : > { %v690_v21 = vadd.f32 %v689_v20, %v688_v19 }
 0x415   : > { %v691_v22 = vrot.slane %v690_v21, 1 }
 0x417   : > { %v692_v23 = vadd.f32 %v691_v22, %v690_v21 }
 0x419   : > { %1232 = vrcp.f32 %v692_v23 }
 0x423   : > { %v1233_v24 = vpop.eup %1232 }
 0x424   : > { %v694_v25 = vmul.f32 %v1233_v24, %v692_v23 }
 0x426   : > { %v695_v26 = vsub.f32 2.0, %v694_v25 }
 0x428   : > { %v696_v27 = vmul.f32 %v1233_v24, %v695_v26 }
 0x42a   : > { %v697_v28 = vmul.f32 %v1229_v13, %v696_v27  ;;  %v698_v29 = vmul.f32 %v1231_v14, %v696_v27 }
 0x42c   : > { %699 = vxpose.xlu0.b32.start [1/2] (short) (narrow) %v697_v28, 8 }
 0x430   : > { %700 = vxpose.xlu0.b32.end [2/2] (short) (narrow) %v698_v29, 8 }
 0x4ac   : > { %v715_v30 = vpop.trf.xlu0 }
 0x4ad   : > { %1058 = vmatmul.mubr.msk.f32.vlgmr.msra.gmra.mrb[2].mxu1 %vm731_vm5, %v715_v30 }
 0x580   : > { %v801_v31 = vpop.f32.mrb[2].mxu1 }
 0x581   : > { %805 = vst [vmem:[%s375_s21] sm:$0xff] %v801_v31  ;;  %v1059_v32 = vpop.f32.mrb[3].mxu1 }
 0x582   : > { %1445 = shalt.err (!%p1442_p7)
}
 0x583   : > { %s1446_s17 = scalar_lea.hbm %s1863_s15, 128  ;;  %s1450_s8 = scalar_lea.hbm %s1911_s7, 512 }
 0x584   : > { %p1447_p13 = scmp.ne.s32.totalorder %s1863_s15, %s1446_s17  ;;  %p1451_p8 = scmp.lt.u32.totalorder %s1863_s15, %s1911_s7 }
 0x585   : > { %p1452_p10 = scmp.lt.u32.totalorder %s1450_s8, %s1446_s17  ;;  %p1454_p5 = scmp.lt.u32.totalorder %s1446_s17, %s1863_s15 }
 0x586   : > { %p1448_p0 = pnand %p1447_p13, %p1933_p12 }
 0x587   : > { %p1453_p11 = por %p1452_p10, %p1451_p8 }
 0x588   : > { %p1449_p2 = pneg %p1448_p0 }
 0x589   : > { %p1455_p4 = por %p1454_p5, %p1453_p11 }
 0x58b   : > { %p1456_p6 = pnand %p1455_p4, %p1449_p2 }
 0x58d   : > { %1459 = shalt.err (!%p1456_p6)
}
 0x58e   : > { %1129 = dma.vmem_to_hbm [thread:$0]  (%p1933_p12), %s1858_s22, 128, %s1863_s15, %s807_s12  }
 0x58f PF: > { %p1171_p9 = scmp.ge.s32.totalorder %s1510_s27, 2  ;;  %s832_s23 = sand.u32 1, %s1498_s24  }
 0x590   : > { %p1934_p1 = scmp.ne.s32.totalorder %s1923_s20, 0  ;;  %s833_s9 = scalar_lea.sflag [#allocation4], %s832_s23 }
 0x592   : > { %p1155_p3 = pnand %p1171_p9, %p1934_p1 }
 0x594   : > { %1493 = dma.done.wait (!%p1155_p3), %s833_s9, 128  }
 0x595   : > { %1495 = vsyncadd (!%p1155_p3), %s833_s9, 4294967168  ;;  %p23_p7 = scmp.ge.s32.totalorder %s1740_s11, 6   ;;  %s1935_s24 = smov %s1502_s25 }
 0x596   : > { %s1936_s25 = smov %s1506_s26  ;;  %s1937_s26 = smov %s1751_s16 }
 0x597   : > { %s1938_s27 = smov %s1740_s11  ;;  %25 = sbr.rel (!%p23_p7) target bundleno = 8 (0x8), region = 117 }
 0x59e   :  { %838 = vsyncpa [#allocation3], 1 }
 0x59f   :  { %840 = vsyncpa [#allocation3 + $0x1], 1 }
 0x5a0   :  { %841 = vsyncpa [#allocation6], 1 }
 0x5a1   :  { %842 = vsyncpa [#allocation9], 1 }
 0x5a2   :  { %843 = vsyncpa [#allocation12], 1 }
 0x5a3   :  { %844 = vsyncpa [#allocation4], 1 }
 0x5a4   :  { %846 = vsyncpa [#allocation4 + $0x1], 1 }

</bundles_post_ra>
